<compile_context>
chip_gen: v6e
topology: v6e:2x2x1
jax: 0.10.0
libtpu: 0.0.40
codegen_flags: <defaults>
</compile_context>

<pallas_src>
import functools

import jax
import jax.numpy as jnp
from jax.experimental import pallas as pl
from jax.experimental.pallas import tpu as pltpu


def _round_up(x, m):
    return ((x + m - 1) // m) * m


def _tpu_generation():
    """Best-effort TPU generation sniff (fallback 6 -> bf16-friendly defaults)."""
    try:
        kind = jax.devices()[0].device_kind.lower()
    except Exception:
        return 6
    for g in (7, 6, 5, 4, 3, 2):
        if f"v{g}" in kind:
            return g
    return 6


def _hidden(acc_f32, bf16_tanh):
    """Hidden-layer activation; returns bf16 ready for the next MXU pass."""
    if bf16_tanh:
        # v6e/v7x: EUP is bf16-capable -> half the tanh pushes, no extra cast.
        return jnp.tanh(acc_f32.astype(jnp.bfloat16))
    # v5e and older: no bf16 VPU/EUP; tanh in f32, then cast for the MXU.
    return jnp.tanh(acc_f32).astype(jnp.bfloat16)


def _fused_kernel(obs_ref, w1_ref, b1_ref, w2_ref, b2_ref, w3_ref, b3_ref,
                  out_ref, *, act_dim, chunk, bf16_tanh):
    """Actor|critic fused into 3 MXU passes; packed [loc | value] output."""
    rows, out_w = out_ref.shape
    n_chunks = rows // chunk
    # Hoisted out of the row loop (JAX does not CSE broadcast_in_dim).
    loc_mask = jax.lax.broadcasted_iota(jnp.int32, (chunk, out_w), 1) < act_dim

    def compute(r):
        x = obs_ref[pl.ds(r, chunk), :].astype(jnp.bfloat16)
        h = _hidden(jnp.dot(x, w1_ref[...],
                            preferred_element_type=jnp.float32) + b1_ref[...],
                    bf16_tanh)
        h = _hidden(jnp.dot(h, w2_ref[...],
                            preferred_element_type=jnp.float32) + b2_ref[...],
                    bf16_tanh)
        z = (jnp.dot(h, w3_ref[...],
                     preferred_element_type=jnp.float32) + b3_ref[...])
        # tanh only the actor (loc) lanes; value lane passes through.
        out_ref[pl.ds(r, chunk), :] = jnp.where(loc_mask, jnp.tanh(z), z)

    if n_chunks == 1:
        compute(0)
    else:
        def body(c):
            compute(pl.multiple_of(c * chunk, 8))
        pl.loop(0, n_chunks)(body)


def _split_kernel(obs_ref,
                  w1a_ref, b1a_ref, w2a_ref, b2a_ref, w3a_ref,
                  w1c_ref, b1c_ref, w2c_ref, b2c_ref, w3c_ref,
                  b3_ref, out_ref, *, act_dim, chunk, bf16_tanh):
    """Large-H path: actor / critic towers as separate dots (no block-diag)."""
    rows, out_w = out_ref.shape
    n_chunks = rows // chunk
    loc_mask = jax.lax.broadcasted_iota(jnp.int32, (chunk, out_w), 1) < act_dim

    def compute(r):
        x = obs_ref[pl.ds(r, chunk), :].astype(jnp.bfloat16)
        # Actor tower.
        ha = _hidden(jnp.dot(x, w1a_ref[...],
                             preferred_element_type=jnp.float32) + b1a_ref[...],
                     bf16_tanh)
        ha = _hidden(jnp.dot(ha, w2a_ref[...],
                             preferred_element_type=jnp.float32) + b2a_ref[...],
                     bf16_tanh)
        # Critic tower.
        hc = _hidden(jnp.dot(x, w1c_ref[...],
                             preferred_element_type=jnp.float32) + b1c_ref[...],
                     bf16_tanh)
        hc = _hidden(jnp.dot(hc, w2c_ref[...],
                             preferred_element_type=jnp.float32) + b2c_ref[...],
                     bf16_tanh)
        # Last layer: weights pre-padded to the packed [loc_pre | value] width
        # in prepare_params -> no in-kernel concat, one lane-contiguous store.
        z = (jnp.dot(ha, w3a_ref[...], preferred_element_type=jnp.float32)
             + jnp.dot(hc, w3c_ref[...], preferred_element_type=jnp.float32)
             + b3_ref[...])
        out_ref[pl.ds(r, chunk), :] = jnp.where(loc_mask, jnp.tanh(z), z)

    if n_chunks == 1:
        compute(0)
    else:
        def body(c):
            compute(pl.multiple_of(c * chunk, 8))
        pl.loop(0, n_chunks)(body)


def prepare_params(params, *, max_fused_width=None):
    """One-time actor+critic weight packing (hoisted out of the per-call path).

    Call once per parameter update; reuse the result for every forward().
    """
    if max_fused_width is None:
        # One native MXU tile: 128 on <= v5e, 256 on v6e/v7x.
        max_fused_width = 256 if _tpu_generation() >= 6 else 128

    bf = jnp.bfloat16
    H = params["w2a"].shape[0]
    A = params["w3a"].shape[1]
    out_w = A + 1

    prepared = {"logstd": params["logstd"]}
    if 2 * H <= max_fused_width:
        # Block-diagonal fusion: zero blocks ride inside one MXU tile for free
        # -> whole network is 3 MXU passes.
        w2 = jnp.zeros((2 * H, 2 * H), jnp.float32)
        w2 = w2.at[:H, :H].set(params["w2a"]).at[H:, H:].set(params["w2c"])
        w3 = jnp.zeros((2 * H, out_w), jnp.float32)
        w3 = w3.at[:H, :A].set(params["w3a"]).at[H:, A:].set(params["w3c"])
        prepared.update(
            w1=jnp.concatenate([params["w1a"], params["w1c"]], 1).astype(bf),
            b1=jnp.concatenate([params["b1a"], params["b1c"]], 1),
            w2=w2.astype(bf),
            b2=jnp.concatenate([params["b2a"], params["b2c"]], 1),
            w3=w3.astype(bf),
            b3=jnp.concatenate([params["b3a"], params["b3c"]], 1),
        )
    else:
        # 2H past one MXU tile: block-diag would double MXU passes and weight
        # VMEM/DMA, so keep the towers separate.  Only the tiny last layer is
        # padded to the packed [loc | value] width.
        w3a = jnp.zeros((H, out_w), jnp.float32).at[:, :A].set(params["w3a"])
        w3c = jnp.zeros((H, out_w), jnp.float32).at[:, A:].set(params["w3c"])
        prepared.update(
            w1a=params["w1a"].astype(bf), b1a=params["b1a"],
            w2a=params["w2a"].astype(bf), b2a=params["b2a"],
            w3a=w3a.astype(bf),
            w1c=params["w1c"].astype(bf), b1c=params["b1c"],
            w2c=params["w2c"].astype(bf), b2c=params["b2c"],
            w3c=w3c.astype(bf),
            b3=jnp.concatenate([params["b3a"], params["b3c"]], 1),
        )
    return prepared


def _choose_tiles(B, block_b, row_chunk):
    # Batch tile: multiple of 8, at most ~block_b.
    tb = _round_up(min(block_b, B), 8)
    # Guarantee >= 2 grid steps when B allows, so the "parallel" batch axis is
    # actually sharded across both TensorCores on v7x.
    if B <= tb and B > 8:
        tb = _round_up(pl.cdiv(B, 2), 8)
    # Inner row chunk bounds vreg live ranges; keep tb an exact multiple.
    chunk = min(_round_up(row_chunk, 8), tb)
    tb = _round_up(tb, chunk)
    b_pad = _round_up(B, tb)
    return tb, chunk, b_pad


def continuous_policy_agent_forward(obs, prepared, *, block_b=1024,
                                    row_chunk=256, bf16_tanh=None):
    """Returns (loc, scale, value): Normal(loc, scale) policy params + V(obs)."""
    if bf16_tanh is None:
        bf16_tanh = _tpu_generation() >= 6
    B, obs_dim = obs.shape

    fused = "w1" in prepared
    if fused:
        A = prepared["w3"].shape[1] - 1
        weights = [prepared[k] for k in ("w1", "b1", "w2", "b2", "w3", "b3")]
        kernel = _fused_kernel
    else:
        A = prepared["w3a"].shape[1] - 1
        weights = [prepared[k] for k in
                   ("w1a", "b1a", "w2a", "b2a", "w3a",
                    "w1c", "b1c", "w2c", "b2c", "w3c", "b3")]
        kernel = _split_kernel
    out_w = A + 1

    tb, chunk, b_pad = _choose_tiles(B, block_b, row_chunk)
    if b_pad != B:
        obs = jnp.pad(obs, ((0, b_pad - B), (0, 0)))
    grid = (b_pad // tb,)

    resident = lambda i: (0, 0)  # same block every step -> weights stay in VMEM
    w_specs = [pl.BlockSpec(w.shape, resident) for w in weights]

    packed = pl.pallas_call(
        functools.partial(kernel, act_dim=A, chunk=chunk, bf16_tanh=bf16_tanh),
        out_shape=jax.ShapeDtypeStruct((b_pad, out_w), jnp.float32),
        grid=grid,
        in_specs=[pl.BlockSpec((tb, obs_dim), lambda i: (i, 0))] + w_specs,
        out_specs=pl.BlockSpec((tb, out_w), lambda i: (i, 0)),
        compiler_params=pltpu.CompilerParams(
            dimension_semantics=("parallel",)),
    )(obs, *weights)

    loc = packed[:B, :A]
    value = packed[:B, A:]
    # scale = exp(logstd) is obs-independent -> computed outside the kernel.
    scale = jnp.broadcast_to(jnp.exp(prepared["logstd"]), loc.shape)
    return loc, scale, value


def init_params(key, obs_dim, act_dim, hid_dim):
    """Deterministic synthetic init (PyTorch-like uniform +/- 1/sqrt(fan_in))."""
    def linear(k, fan_in, fan_out):
        kw, kb = jax.random.split(k)
        lim = 1.0 / jnp.sqrt(fan_in)
        w = jax.random.uniform(kw, (fan_in, fan_out), jnp.float32, -lim, lim)
        b = jax.random.uniform(kb, (1, fan_out), jnp.float32, -lim, lim)
        return w, b

    ks = jax.random.split(key, 6)
    w1a, b1a = linear(ks[0], obs_dim, hid_dim)
    w2a, b2a = linear(ks[1], hid_dim, hid_dim)
    w3a, b3a = linear(ks[2], hid_dim, act_dim)
    w1c, b1c = linear(ks[3], obs_dim, hid_dim)
    w2c, b2c = linear(ks[4], hid_dim, hid_dim)
    w3c, b3c = linear(ks[5], hid_dim, 1)
    logstd = jnp.zeros((1, act_dim), jnp.float32)   # nn.Parameter(zeros(act_dim))
    return dict(w1a=w1a, b1a=b1a, w2a=w2a, b2a=b2a, w3a=w3a, b3a=b3a,
                w1c=w1c, b1c=b1c, w2c=w2c, b2c=b2c, w3c=w3c, b3c=b3c,
                logstd=logstd)


def _reference_forward_f32(obs, p):
    h = jnp.tanh(obs @ p["w1a"] + p["b1a"])
    h = jnp.tanh(h @ p["w2a"] + p["b2a"])
    loc = jnp.tanh(h @ p["w3a"] + p["b3a"])
    hc = jnp.tanh(obs @ p["w1c"] + p["b1c"])
    hc = jnp.tanh(hc @ p["w2c"] + p["b2c"])
    val = hc @ p["w3c"] + p["b3c"]
    scale = jnp.broadcast_to(jnp.exp(p["logstd"]), loc.shape)
    return loc, scale, val


def _reference_forward_bf16(obs, p, *, bf16_tanh):
    """Precision-matched reference (bf16 MXU operands, f32 accumulate)."""
    bf = jnp.bfloat16

    def lin(xb, w, b):
        return jnp.dot(xb, w.astype(bf), preferred_element_type=jnp.float32) + b

    def hid(acc):
        return jnp.tanh(acc.astype(bf)) if bf16_tanh else jnp.tanh(acc).astype(bf)

    x = obs.astype(bf)
    h = hid(lin(x, p["w1a"], p["b1a"]))
    h = hid(lin(h, p["w2a"], p["b2a"]))
    loc = jnp.tanh(lin(h, p["w3a"], p["b3a"]))
    hc = hid(lin(x, p["w1c"], p["b1c"]))
    hc = hid(lin(hc, p["w2c"], p["b2c"]))
    val = lin(hc, p["w3c"], p["b3c"])
    scale = jnp.broadcast_to(jnp.exp(p["logstd"]), loc.shape)
    return loc, scale, val


if __name__ == "__main__":
    key = jax.random.PRNGKey(0)
    k_obs, k_par, k_obs2, k_par2, k_obs3 = jax.random.split(key, 5)

    bf16_tanh = _tpu_generation() >= 6
    tight_atol = 3e-2 if bf16_tanh else 5e-3   # vs the precision-matched ref

    fwd = jax.jit(continuous_policy_agent_forward,
                  static_argnames=("block_b", "row_chunk", "bf16_tanh"))

    # --- small case, fused (block-diagonal) path --------------------------
    B, obs_dim, act_dim, hid_dim = 8, 16, 4, 32
    obs = jax.random.normal(k_obs, (B, obs_dim), jnp.float32)
    params = init_params(k_par, obs_dim, act_dim, hid_dim)
    prepared = prepare_params(params)           # one-time fusion (hoisted)

    loc, scale, value = jax.block_until_ready(
        fwd(obs, prepared, bf16_tanh=bf16_tanh))
    assert loc.shape == (B, act_dim) and scale.shape == (B, act_dim)
    assert value.shape == (B, 1)

    bl, bs, bv = _reference_forward_bf16(obs, params, bf16_tanh=bf16_tanh)
    assert jnp.allclose(loc, bl, atol=tight_atol)
    assert jnp.allclose(scale, bs, atol=1e-6)
    assert jnp.allclose(value, bv, atol=tight_atol)

    rl, rs, rv = _reference_forward_f32(obs, params)
    assert jnp.allclose(loc, rl, atol=8e-2)
    assert jnp.allclose(scale, rs, atol=1e-5)
    assert jnp.allclose(value, rv, atol=8e-2)

    # --- batch padding + multi-step grid + in-kernel row chunking ---------
    B2 = 300
    obs2 = jax.random.normal(k_obs2, (B2, obs_dim), jnp.float32)
    loc2, scale2, value2 = jax.block_until_ready(
        fwd(obs2, prepared, block_b=128, row_chunk=64, bf16_tanh=bf16_tanh))
    rl2, rs2, rv2 = _reference_forward_f32(obs2, params)
    assert loc2.shape == (B2, act_dim) and value2.shape == (B2, 1)
    assert jnp.allclose(loc2, rl2, atol=8e-2)
    assert jnp.allclose(scale2, rs2, atol=1e-5)
    assert jnp.allclose(value2, rv2, atol=8e-2)

    # --- large-H split path (block-diagonal scaling guard) ----------------
    B3, hid_dim3 = 64, 128
    params3 = init_params(k_par2, obs_dim, act_dim, hid_dim3)
    prepared3 = prepare_params(params3, max_fused_width=128)   # force split
    obs3 = jax.random.normal(k_obs3, (B3, obs_dim), jnp.float32)
    loc3, scale3, value3 = jax.block_until_ready(
        fwd(obs3, prepared3, bf16_tanh=bf16_tanh))
    bl3, bs3, bv3 = _reference_forward_bf16(obs3, params3, bf16_tanh=bf16_tanh)
    assert loc3.shape == (B3, act_dim) and value3.shape == (B3, 1)
    assert jnp.allclose(loc3, bl3, atol=tight_atol)
    assert jnp.allclose(scale3, bs3, atol=1e-6)
    assert jnp.allclose(value3, bv3, atol=tight_atol)

    # TODO(synk): rollout() (env stepping, Normal.sample/log_prob/entropy) is
    # host-side control flow / RNG over an external env; not a kernel.
    print("KERNEL_OK")
</pallas_src>

<mosaic_0001>
module attributes {stable_mosaic.version = 11 : i64} {
  func.func @_fused_kernel(%arg0: i32, %arg1: memref<8x16xf32, #tpu.memory_space<vmem>>, %arg2: memref<16x64xbf16, #tpu.memory_space<vmem>>, %arg3: memref<1x64xf32, #tpu.memory_space<vmem>>, %arg4: memref<64x64xbf16, #tpu.memory_space<vmem>>, %arg5: memref<1x64xf32, #tpu.memory_space<vmem>>, %arg6: memref<64x5xbf16, #tpu.memory_space<vmem>>, %arg7: memref<1x5xf32, #tpu.memory_space<vmem>>, %arg8: memref<8x5xf32, #tpu.memory_space<vmem>>) attributes {dimension_semantics = [#tpu.dimension_semantics<parallel>], iteration_bounds = array<i64: 1>, scalar_prefetch = 0 : i64, scratch_operands = 0 : i64, tpu.core_type = #tpu.core_type<tc>, window_params = [{transform_indices = @transform_0, window_bounds = array<i64: 8, 16>}, {pipeline_mode = #tpu.pipeline_mode<synchronous>, transform_indices = @transform_1, window_bounds = array<i64: 16, 64>}, {pipeline_mode = #tpu.pipeline_mode<synchronous>, transform_indices = @transform_2, window_bounds = array<i64: 1, 64>}, {pipeline_mode = #tpu.pipeline_mode<synchronous>, transform_indices = @transform_3, window_bounds = array<i64: 64, 64>}, {pipeline_mode = #tpu.pipeline_mode<synchronous>, transform_indices = @transform_4, window_bounds = array<i64: 1, 64>}, {pipeline_mode = #tpu.pipeline_mode<synchronous>, transform_indices = @transform_5, window_bounds = array<i64: 64, 5>}, {pipeline_mode = #tpu.pipeline_mode<synchronous>, transform_indices = @transform_6, window_bounds = array<i64: 1, 5>}, {transform_indices = @transform_7, window_bounds = array<i64: 8, 5>}]} {
    %0 = tpu.iota {dimensions = array<i32: 1>} : vector<8x5xi32>
    %c4_i32 = arith.constant 4 : i32
    %1 = vector.broadcast %c4_i32 : i32 to vector<8x5xi32>
    %2 = arith.cmpi slt, %0, %1 : vector<8x5xi32>
    %c0 = arith.constant 0 : index
    %c0_0 = arith.constant 0 : index
    %3 = vector.load %arg1[%c0, %c0_0] : memref<8x16xf32, #tpu.memory_space<vmem>>, vector<8x16xf32>
    %4 = arith.truncf %3 : vector<8x16xf32> to vector<8x16xbf16>
    %c0_1 = arith.constant 0 : index
    %c0_2 = arith.constant 0 : index
    %5 = vector.load %arg2[%c0_1, %c0_2] : memref<16x64xbf16, #tpu.memory_space<vmem>>, vector<16x64xbf16>
    %cst = arith.constant dense<0.000000e+00> : vector<8x64xf32>
    %6 = tpu.matmul %4, %5, %cst {dimension_numbers = #tpu.dot_dimension_numbers<[1], [0], [0], [1], [0, 0, 1, 1], [], []>} : vector<8x16xbf16>, vector<16x64xbf16>, vector<8x64xf32> -> vector<8x64xf32>
    %c0_3 = arith.constant 0 : index
    %c0_4 = arith.constant 0 : index
    %7 = vector.load %arg3[%c0_3, %c0_4] : memref<1x64xf32, #tpu.memory_space<vmem>>, vector<1x64xf32>
    %8 = vector.broadcast %7 : vector<1x64xf32> to vector<8x64xf32>
    %9 = arith.addf %6, %8 : vector<8x64xf32>
    %10 = arith.truncf %9 : vector<8x64xf32> to vector<8x64xbf16>
    %11 = math.tanh %10 : vector<8x64xbf16>
    %c0_5 = arith.constant 0 : index
    %c0_6 = arith.constant 0 : index
    %12 = vector.load %arg4[%c0_5, %c0_6] : memref<64x64xbf16, #tpu.memory_space<vmem>>, vector<64x64xbf16>
    %cst_7 = arith.constant dense<0.000000e+00> : vector<8x64xf32>
    %13 = tpu.matmul %11, %12, %cst_7 {dimension_numbers = #tpu.dot_dimension_numbers<[1], [0], [0], [1], [0, 0, 1, 1], [], []>} : vector<8x64xbf16>, vector<64x64xbf16>, vector<8x64xf32> -> vector<8x64xf32>
    %c0_8 = arith.constant 0 : index
    %c0_9 = arith.constant 0 : index
    %14 = vector.load %arg5[%c0_8, %c0_9] : memref<1x64xf32, #tpu.memory_space<vmem>>, vector<1x64xf32>
    %15 = vector.broadcast %14 : vector<1x64xf32> to vector<8x64xf32>
    %16 = arith.addf %13, %15 : vector<8x64xf32>
    %17 = arith.truncf %16 : vector<8x64xf32> to vector<8x64xbf16>
    %18 = math.tanh %17 : vector<8x64xbf16>
    %c0_10 = arith.constant 0 : index
    %c0_11 = arith.constant 0 : index
    %19 = vector.load %arg6[%c0_10, %c0_11] : memref<64x5xbf16, #tpu.memory_space<vmem>>, vector<64x5xbf16>
    %cst_12 = arith.constant dense<0.000000e+00> : vector<8x5xf32>
    %20 = tpu.matmul %18, %19, %cst_12 {dimension_numbers = #tpu.dot_dimension_numbers<[1], [0], [0], [1], [0, 0, 1, 1], [], []>} : vector<8x64xbf16>, vector<64x5xbf16>, vector<8x5xf32> -> vector<8x5xf32>
    %c0_13 = arith.constant 0 : index
    %c0_14 = arith.constant 0 : index
    %21 = vector.load %arg7[%c0_13, %c0_14] : memref<1x5xf32, #tpu.memory_space<vmem>>, vector<1x5xf32>
    %22 = vector.broadcast %21 : vector<1x5xf32> to vector<8x5xf32>
    %23 = arith.addf %20, %22 : vector<8x5xf32>
    %24 = math.tanh %23 : vector<8x5xf32>
    %25 = arith.select %2, %24, %23 : vector<8x5xi1>, vector<8x5xf32>
    %c0_15 = arith.constant 0 : index
    %c0_16 = arith.constant 0 : index
    %26 = vector.load %arg8[%c0_15, %c0_16] : memref<8x5xf32, #tpu.memory_space<vmem>>, vector<8x5xf32>
    tpu.vector_store %arg8[%c0_15, %c0_16], %25 {strides = array<i32>} : memref<8x5xf32, #tpu.memory_space<vmem>>, vector<8x5xf32>,
    return
  }
  func.func @transform_0(%arg0: i32) -> (i32, i32) {
    %c0_i32 = arith.constant 0 : i32
    %c0_i32_0 = arith.constant 0 : i32
    return %arg0, %c0_i32 : i32, i32
  }
  func.func @transform_1(%arg0: i32) -> (i32, i32) {
    %c0_i32 = arith.constant 0 : i32
    %c0_i32_0 = arith.constant 0 : i32
    %c0_i32_1 = arith.constant 0 : i32
    return %c0_i32, %c0_i32_0 : i32, i32
  }
  func.func @transform_2(%arg0: i32) -> (i32, i32) {
    %c0_i32 = arith.constant 0 : i32
    %c0_i32_0 = arith.constant 0 : i32
    %c0_i32_1 = arith.constant 0 : i32
    return %c0_i32, %c0_i32_0 : i32, i32
  }
  func.func @transform_3(%arg0: i32) -> (i32, i32) {
    %c0_i32 = arith.constant 0 : i32
    %c0_i32_0 = arith.constant 0 : i32
    %c0_i32_1 = arith.constant 0 : i32
    return %c0_i32, %c0_i32_0 : i32, i32
  }
  func.func @transform_4(%arg0: i32) -> (i32, i32) {
    %c0_i32 = arith.constant 0 : i32
    %c0_i32_0 = arith.constant 0 : i32
    %c0_i32_1 = arith.constant 0 : i32
    return %c0_i32, %c0_i32_0 : i32, i32
  }
  func.func @transform_5(%arg0: i32) -> (i32, i32) {
    %c0_i32 = arith.constant 0 : i32
    %c0_i32_0 = arith.constant 0 : i32
    %c0_i32_1 = arith.constant 0 : i32
    return %c0_i32, %c0_i32_0 : i32, i32
  }
  func.func @transform_6(%arg0: i32) -> (i32, i32) {
    %c0_i32 = arith.constant 0 : i32
    %c0_i32_0 = arith.constant 0 : i32
    %c0_i32_1 = arith.constant 0 : i32
    return %c0_i32, %c0_i32_0 : i32, i32
  }
  func.func @transform_7(%arg0: i32) -> (i32, i32) {
    %c0_i32 = arith.constant 0 : i32
    %c0_i32_0 = arith.constant 0 : i32
    return %arg0, %c0_i32 : i32, i32
  }
}

</mosaic_0001>

<bundles_post_ra>
// kernel: continuous_policy_agent_forward.1
= control target key start
LH: loop header
LB: loop body
LE: loop exit
PB: predicated region body
PF: predicated region fallthrough
CT: control target
= control target key end

     0   :  { %12 = vsyncpa [#allocation3], 0  ;;  %s541_s0 = inlined_call_operand.vmem [shape: f32[8,16], index: 0, kind: input, shape index: {}]   ;;  %s542_s1 = inlined_call_operand.hbm [shape: bf16[16,64], index: 1, kind: input, shape index: {}]   ;;  %s543_s2 = inlined_call_operand.vmem [shape: f32[1,64], index: 2, kind: input, shape index: {}]   ;;  %s544_s3 = inlined_call_operand.vmem [shape: bf16[64,64], index: 3, kind: input, shape index: {}]   ;;  %s545_s4 = inlined_call_operand.hbm [shape: f32[1,64], index: 4, kind: input, shape index: {}]   ;;  %s546_s5 = inlined_call_operand.vmem [shape: bf16[64,5], index: 5, kind: input, shape index: {}]   ;;  %s547_s6 = inlined_call_operand.hbm [shape: f32[1,5], index: 6, kind: input, shape index: {}]   ;;  %s548_s7 = inlined_call_operand.vmem [shape: f32[8,5], index: 7, kind: output, shape index: {}]  }
   0x1   :  { %13 = vsyncpa [#allocation5], 0  ;;  %s450_s24 = smov [#allocation4]   ;;  %s451_s26 = smov [#allocation2]  }
   0x2   :  { %s38_s25 = sshll.u32 %s450_s24, 4  ;;  %s21_s27 = sshll.u32 %s451_s26, 4  ;;  %s39_s25 = int_to_ptr.vmem [resolvable:$true] %s38_s25  ;;  %s22_s27 = int_to_ptr.vmem [resolvable:$true] %s21_s27 }
   0x3   :  { %s394_s28 = scalar_lea.vmem %s39_s25, 16  ;;  %s398_s29 = scalar_lea.vmem %s39_s25, 32 }
   0x4   :  { %p395_p0 = scmp.ne.s32.totalorder %s39_s25, %s394_s28  ;;  %p399_p1 = scmp.lt.s32.totalorder %s39_s25, %s39_s25 }
   0x5   :  { %p400_p2 = scmp.lt.s32.totalorder %s398_s29, %s394_s28 }
   0x7   :  { %p401_p3 = por %p400_p2, %p399_p1 }
   0x9   :  { %p402_p4 = pnand %p401_p3, %p395_p0 }
   0xb   :  { %405 = shalt.err (!%p402_p4)
}
   0xc   :  { %41 = dma.hbm_to_vmem [thread:$0]  %s545_s4, 16, %s39_s25, [#allocation5]  }
   0xd   :  { %s414_s9 = scalar_lea.vmem %s22_s27, 128  ;;  %p419_p6 = scmp.lt.s32.totalorder %s22_s27, %s22_s27 }
   0xe   :  { %p415_p5 = scmp.ne.s32.totalorder %s22_s27, %s414_s9  ;;  %p420_p7 = scmp.lt.s32.totalorder %s414_s9, %s414_s9 }
  0x10   :  { %p421_p8 = por %p420_p7, %p419_p6 }
  0x12   :  { %p422_p9 = pnand %p421_p8, %p415_p5 }
  0x14   :  { %425 = shalt.err (!%p422_p9)
}
  0x15   :  { %s452_s10 = smov 64   ;;  %s453_s11 = smov 4  }
  0x16   :  { %27 = dma.hbm_to_vmem [thread:$0]  %s542_s1, 128, %s22_s27, [#allocation3], %s452_s10, %s452_s10, %s453_s11  }
  0x17   :  { %s454_s14 = smov [#allocation6]  }
  0x18   :  { %s50_s15 = sshll.u32 %s454_s14, 4  ;;  %s51_s15 = int_to_ptr.vmem [resolvable:$true] %s50_s15 }
  0x19   :  { %s434_s16 = scalar_lea.vmem %s51_s15, 16  ;;  %s438_s17 = scalar_lea.vmem %s51_s15, 32 }
  0x1a   :  { %p435_p10 = scmp.ne.s32.totalorder %s51_s15, %s434_s16  ;;  %p439_p11 = scmp.lt.s32.totalorder %s51_s15, %s51_s15 }
  0x1b   :  { %p440_p12 = scmp.lt.s32.totalorder %s438_s17, %s434_s16 }
  0x1d   :  { %p441_p13 = por %p440_p12, %p439_p11 }
  0x1f   :  { %p442_p0 = pnand %p441_p13, %p435_p10 }
  0x21   :  { %445 = shalt.err (!%p442_p0)
}
  0x22   :  { %53 = dma.hbm_to_vmem [thread:$0]  %s547_s6, 16, %s51_s15, [#allocation5]  }
  0x23   :  { %446 = dma.done.wait [#allocation3], 128  }
  0x24   :  { %447 = vsyncadd [#allocation3], 4294967168 }
  0x25   :  { %448 = dma.done.wait [#allocation5], 32  }
  0x26   :  { %449 = vsyncadd [#allocation5], 4294967264  ;;  %v455_v0 = vmov 0.0   ;;  %vm456_vm0 = vmmov 0   ;;  %v371_v1 = vld [vmem:[#allocation2] sm:$0xff]   ;;  %vm84_vm1 = vcmask 130048   ;;  %v64_v33 = vlaneseq }
  0x27   :  { %334 = vmatprep.subr.bf16.mxu0 %v455_v0  ;;  %336 = vmatprep.mubr.msk.bf16.mxu0 %vm456_vm0, %v455_v0  ;;  %v67_v2 = vld [vmem:[%s541_s0] sm:$0xff]  ;;  %v372_v4 = vld [vmem:[%s544_s3 + $0x18] sm:$0xff]   ;;  %v373_v5 = vld [vmem:[%s544_s3 + $0x10] sm:$0xff]   ;;  %vm169_vm2 = vcmask 523264   ;;  %vm299_vm4 = vcmask 39936  }
  0x28   :  { %340 = vmatprep.subr.bf16.mxu1 %v455_v0  ;;  %348 = vmatprep.mubr.msk.bf16.mxu1 %vm456_vm0, %v455_v0  ;;  %v68_v3 = vpack.c.bf16 %v67_v2, %v67_v2  ;;  %v374_v6 = vld [vmem:[%s544_s3 + $0x8] sm:$0xff]   ;;  %v375_v7 = vld [vmem:[%s544_s3] sm:$0xff]   ;;  %v376_v16 = vld [vmem:[%s546_s5 + $0x18] sm:$0xff]   ;;  %v65_v35 = vand.u32 127, %v64_v33 }
  0x29   :  { %335 = vmatpush3.bf16.msra.mxu0 %v371_v1  ;;  %341 = vmatpush3.bf16.msra.mxu1 %v372_v4  ;;  %v307_v8 = vld [vmem:[%s543_s2] ss:$0 sm:$0xff]  ;;  %v377_v17 = vld [vmem:[%s546_s5 + $0x10] sm:$0xff]   ;;  %v378_v18 = vld [vmem:[%s546_s5 + $0x8] sm:$0xff]  }
  0x2a   :  { %352 = vmatprep.subr.bf16.mxu0 %v455_v0  ;;  %342 = vmatprep.subr.bf16.mxu1 %v455_v0  ;;  %v379_v19 = vld [vmem:[%s546_s5] sm:$0xff]   ;;  %v310_v20 = vld [vmem:[#allocation4] ss:$0 sm:$0xff]  ;;  %v316_v28 = vld [vmem:[#allocation6] ss:$0 sm:$0xff]  ;;  %vm66_vm3 = vcmp.lt.s32.totalorder %v65_v35, 4 }
  0x2c   :  { %337 = vmatmul.mubr.msk.bf16.vlgmr.msra.gmra.mxu0 %vm84_vm1, %v68_v3 }
  0x2d   :  { %360 = vmatprep.mubr.msk.bf16.mxu0 %vm456_vm0, %v455_v0  ;;  %343 = vmatpush3.bf16.msra.mxu1 %v373_v5 }
  0x2e   :  { %344 = vmatprep.subr.bf16.mxu1 %v455_v0  ;;  %353 = vmatpush3.bf16.msra.mxu0 %v376_v16 }
  0x2f   :  { %354 = vmatprep.subr.bf16.mxu0 %v455_v0 }
  0x31   :  { %345 = vmatpush3.bf16.msra.mxu1 %v374_v6 }
  0x32   :  { %346 = vmatprep.subr.bf16.mxu1 %v455_v0  ;;  %355 = vmatpush3.bf16.msra.mxu0 %v377_v17 }
  0x33   :  { %356 = vmatprep.subr.bf16.mxu0 %v455_v0 }
  0x35   :  { %347 = vmatpush3.bf16.msra.mxu1 %v375_v7 }
  0x36   :  { %357 = vmatpush3.bf16.msra.mxu0 %v378_v18 }
  0x37   :  { %358 = vmatprep.subr.bf16.mxu0 %v455_v0 }
  0x3a   :  { %359 = vmatpush3.bf16.msra.mxu0 %v379_v19 }
  0xec   :  { %v122_v9 = vpop.f32.mrf.mxu0 }
  0xed   :  { %v123_v10 = vadd.f32 %v307_v8, %v122_v9 }
  0xee   :  { %v338_v11 = vpop.f32.mrf.mxu0 }
  0xef   :  { %v128_v12 = vpack.c.bf16 %v123_v10, %v123_v10 }
  0xf0   :  { %v125_v13 = vpop.f32.mrf.mxu0 }
  0xf1   :  { %380 = vtanh.bf16 %v128_v12 }
  0xf2   :  { %v339_v14 = vpop.f32.mrf.mxu0 }
  0xff   :  { %v381_v15 = vpop.eup %380 }
 0x100   :  { %349 = vmatmul.mubr.msk.bf16.vlgmr.msra.gmra.mxu1 %vm169_vm2, %v381_v15 }
 0x1c0   :  { %v207_v21 = vpop.f32.mrf.mxu1 }
 0x1c1   :  { %v208_v22 = vadd.f32 %v310_v20, %v207_v21 }
 0x1c2   :  { %v350_v23 = vpop.f32.mrf.mxu1 }
 0x1c3   :  { %v213_v24 = vpack.c.bf16 %v208_v22, %v208_v22 }
 0x1c4   :  { %v210_v25 = vpop.f32.mrf.mxu1 }
 0x1c5   :  { %382 = vtanh.bf16 %v213_v24 }
 0x1c6   :  { %v351_v26 = vpop.f32.mrf.mxu1 }
 0x1d3   :  { %v383_v27 = vpop.eup %382 }
 0x1d4   :  { %361 = vmatmul.mubr.msk.bf16.vlgmr.msra.gmra.mxu0 %vm169_vm2, %v383_v27 }
 0x294   :  { %v291_v29 = vpop.f32.mrf.mxu0 }
 0x295   :  { %v292_v30 = vadd.f32 %v316_v28, %v291_v29 }
 0x296   :  { %v362_v31 = vpop.f32.mrf.mxu0 }
 0x297   :  { %384 = vtanh.f32 %v292_v30 }
 0x298   :  { %v294_v32 = vpop.f32.mrf.mxu0 }
 0x29a   :  { %v363_v34 = vpop.f32.mrf.mxu0 }
 0x2a4   :  { %v385_v36 = vpop.eup %384 }
 0x2a5   :  { %v298_v37 = vsel %vm66_vm3, %v385_v36, %v292_v30 }
 0x2a6   :  { %300 = vst.msk [vmem:[%s548_s7] sm:$0xff] %vm299_vm4, %v298_v37 }
 0x2a7   :  { %305 = vsyncpa [#allocation3], 1 }
 0x2a8   :  { %306 = vsyncpa [#allocation5], 1 }

</bundles_post_ra>
